<compile_context>
chip_gen: v7x
topology: tpu7x:2x2x1
jax: 0.10.0
libtpu: 0.0.40
codegen_flags: <defaults>
</compile_context>

<pallas_src>
import functools

import jax
import jax.numpy as jnp
from jax import lax
from jax.experimental import pallas as pl
from jax.experimental.pallas import tpu as pltpu


# ----------------------- module configuration (matches __init__) -----------------------
BATCH = 2
NUM_SLOTS = 4          # num_slots
SLOT_SIZE = 32         # slot_size
ACTION_FEATURES = 16   # action_features (action_encoding=True)
ACTION_SIZE = 8        # action_size
NUM_OBJECTS = 5        # num_objects_total
IDENTITY_FEATURES = ACTION_FEATURES  # identity_encoding=True
EPSILON = 1e-8
LN_EPS = 1e-5          # torch.nn.LayerNorm default eps

# ----------------------------- packed slab layouts -----------------------------
# Input slab x (IN_ROWS, IN_WIDTH):
#   rows 0:B*O, lanes 0:A        -> actions (batch-stacked)
#   rows 0:B*O, lane  A          -> 1.0     (folds the action-encoder bias)
#   rows 0:B*S, lanes 16:16+D    -> slots   (batch-stacked)
IN_ROWS = 16                       # >= max(B*S, B*O), sublane-tile aligned
ONES_LANE = ACTION_SIZE            # lane 8
SLOT_LANE = 16
IN_WIDTH = SLOT_LANE + SLOT_SIZE   # 48
# Const slab (CONST_ROWS, W_NCOLS):
#   rows 0:48  = block-diag fused weight W: [wa^T ; ba ; 0 | 0 ; tiled w_logit^T]
#   rows 48:64 = [wv_eff (LN-gamma folded) | bv (LN-beta folded, row-broadcast)]
W_KROWS = IN_WIDTH                 # 48 (K of the fused matmul == input lanes)
W_NCOLS = 2 * ACTION_FEATURES      # 32 (cols 0:16 = a_enc, cols 16:32 = tiled logits)
CONST_ROWS = W_KROWS + ACTION_FEATURES  # 64
OUT_WIDTH = 32                     # lanes 0:16 action_slots, lanes 16:21 attention


# ----------------------------------- kernel -----------------------------------
def _action_binding_kernel(x_ref, const_ref, out_ref, *, batch, num_slots, num_objects):
    F_ = ACTION_FEATURES
    bs = batch * num_slots

    x = x_ref[...]                                       # (16, 48)
    w_comb = const_ref[0:W_KROWS, :]                     # (48, 32)
    wv_eff = const_ref[W_KROWS:CONST_ROWS, 0:F_]         # (16, 16)
    bv_b = const_ref[W_KROWS:CONST_ROWS, F_:2 * F_]      # (16, 16) pre-broadcast bias

    # One fused matmul: lanes 0:16 -> action encoding (+bias via ones lane),
    # lanes 16:32 -> attention logits tiled per batch block.
    y = jnp.dot(x, w_comb, preferred_element_type=jnp.float32)   # (16, 32)

    # ---- LayerNorm (affine folded into wv_eff / bv) + V projection ----
    a_enc = y[:, 0:F_]                                   # (16, 16); junk rows are zero
    mean = jnp.mean(a_enc, axis=-1, keepdims=True)
    cen = a_enc - mean
    var = jnp.mean(cen * cen, axis=-1, keepdims=True)
    normed = cen * lax.rsqrt(var + LN_EPS)
    v = jnp.dot(normed, wv_eff, preferred_element_type=jnp.float32) + bv_b   # (16, 16)

    # ---- block-diagonal softmax over slots, vectorized across batches ----
    scores = y[0:bs, F_:]                                # (8, 16); col b*O+o = logit(o)
    r_iota = lax.broadcasted_iota(jnp.int32, scores.shape, 0)
    c_iota = lax.broadcasted_iota(jnp.int32, scores.shape, 1)

    def _blk(b):
        return ((r_iota >= b * num_slots) & (r_iota < (b + 1) * num_slots) &
                (c_iota >= b * num_objects) & (c_iota < (b + 1) * num_objects))

    mask = _blk(0)
    for b in range(1, batch):
        mask = mask | _blk(b)

    neg = jnp.float32(-1e30)
    sm = jnp.where(mask, scores, neg)
    col_max = jnp.max(sm, axis=0, keepdims=True)         # one full-tile sublane reduce
    e = jnp.where(mask, jnp.exp(sm - col_max), jnp.float32(0.0))
    denom = jnp.sum(e, axis=0, keepdims=True)            # one full-tile sublane reduce
    recip = pl.reciprocal(jnp.maximum(denom, jnp.float32(1e-20)), approx=True)
    attn = e * recip                                     # (8, 16); exact 0 off-block
    attn_eps = attn + jnp.where(mask, jnp.float32(EPSILON), jnp.float32(0.0))

    # ---- aggregation: one matmul against the full V slab ----
    # (padded / other-batch V rows are hit only by zero attention columns)
    out_slots = jnp.dot(attn_eps, v, preferred_element_type=jnp.float32)   # (8, 16)

    # ---- compact attention back to (B*S, O): off-block entries are exactly 0 ----
    attn_c = attn[:, 0:num_objects]
    for b in range(1, batch):
        attn_c = attn_c + attn[:, b * num_objects:(b + 1) * num_objects]

    pad = jnp.zeros((bs, OUT_WIDTH - F_ - num_objects), jnp.float32)
    out_ref[...] = jnp.concatenate([out_slots, attn_c, pad], axis=-1)   # one full store


# ------------------------ constant folding (run ONCE, outside jit) ------------------------
def pack_constants(params, *, batch=BATCH, num_objects=NUM_OBJECTS, slot_size=SLOT_SIZE):
    F_ = ACTION_FEATURES
    A = ACTION_SIZE
    D = slot_size
    O = num_objects

    wa_t = params["wa"].T                                     # (A, F)
    wv_t = params["wv"].T                                     # (F, F)
    wv_eff = params["ln_g"][:, None] * wv_t                   # LN gamma folded
    bv = params["ln_b"] @ wv_t                                # LN beta folded

    # identity_encoder(eye) -> project_k -> project_q chain folded to one constant.
    id_emb = params["wi"].T + params["bi"][None, :]           # (O, If)
    k_const = id_emb @ params["wk"].T                         # (O, If)
    w_logit_t = (float(D) ** -0.5) * (k_const @ params["wq"]).T   # (D, O)

    slab = jnp.zeros((CONST_ROWS, W_NCOLS), jnp.float32)
    slab = slab.at[0:A, 0:F_].set(wa_t)
    slab = slab.at[ONES_LANE, 0:F_].set(params["ba"])
    for b in range(batch):                                    # tile logits per batch block
        slab = slab.at[SLOT_LANE:SLOT_LANE + D, F_ + b * O:F_ + (b + 1) * O].set(w_logit_t)
    slab = slab.at[W_KROWS:W_KROWS + F_, 0:F_].set(wv_eff)
    slab = slab.at[W_KROWS:W_KROWS + F_, F_:2 * F_].set(
        jnp.broadcast_to(bv[None, :], (F_, F_)))
    return slab


# ----------------------------------- wrapper -----------------------------------
@jax.jit
def action_binding_attention(slots, actions, const_slab):
    """slots: (B, S, D) f32, actions: (B, O, A) f32, const_slab: prebuilt (64, 32)."""
    B, S, D = slots.shape
    _, O, A = actions.shape
    F_ = ACTION_FEATURES

    # Pack both inputs (+ bias ones-lane) into one slab -> a single input DMA.
    x = jnp.zeros((IN_ROWS, IN_WIDTH), jnp.float32)
    x = x.at[0:B * O, 0:A].set(actions.reshape(B * O, A))
    x = x.at[0:B * O, ONES_LANE].set(1.0)
    x = x.at[0:B * S, SLOT_LANE:SLOT_LANE + D].set(slots.reshape(B * S, D))

    kernel = functools.partial(
        _action_binding_kernel, batch=B, num_slots=S, num_objects=O)
    vmem = pl.BlockSpec(memory_space=pltpu.MemorySpace.VMEM)

    out = pl.pallas_call(
        kernel,
        out_shape=jax.ShapeDtypeStruct((B * S, OUT_WIDTH), jnp.float32),
        in_specs=[vmem, vmem],
        out_specs=vmem,
    )(x, const_slab)

    action_slots = out[:, 0:F_].reshape(B, S, F_)
    action_attention = out[:, F_:F_ + O].reshape(B, S, O).transpose(0, 2, 1)  # (B, O, S)
    return action_slots, action_attention


# ------------------------------ pure-JAX reference ------------------------------
def _reference(slots, actions, params):
    obj_id = jnp.eye(NUM_OBJECTS, dtype=jnp.float32)[None]      # (1, O, O)
    a_enc = actions @ params["wa"].T + params["ba"]              # (B, O, F)
    id_emb = obj_id @ params["wi"].T + params["bi"]              # (1, O, If)
    q = slots @ params["wq"].T                                   # (B, S, If)
    k = id_emb @ params["wk"].T                                  # (1, O, If)
    mean = jnp.mean(a_enc, axis=-1, keepdims=True)
    var = jnp.mean((a_enc - mean) ** 2, axis=-1, keepdims=True)
    a_ln = (a_enc - mean) / jnp.sqrt(var + LN_EPS)
    a_ln = a_ln * params["ln_g"] + params["ln_b"]
    v = a_ln @ params["wv"].T                                    # (B, O, F)
    logits = (SLOT_SIZE ** -0.5) * jnp.einsum("xof,bsf->bos", k, q)
    attn = jax.nn.softmax(logits, axis=-1)                       # (B, O, S)
    action_slots = jnp.einsum("bos,bof->bsf", attn + EPSILON, v)
    return action_slots, attn


# ----------------------------------- main -----------------------------------
if __name__ == "__main__":
    key = jax.random.PRNGKey(0)
    ks = jax.random.split(key, 12)

    slots = jax.random.normal(ks[0], (BATCH, NUM_SLOTS, SLOT_SIZE), jnp.float32)
    actions = jax.random.normal(ks[1], (BATCH, NUM_OBJECTS, ACTION_SIZE), jnp.float32)

    params = {
        # project_q_action: Linear(slot_size -> identity_features, bias=False)
        "wq": jax.random.normal(ks[2], (IDENTITY_FEATURES, SLOT_SIZE), jnp.float32) * 0.1,
        # project_k_action: Linear(identity_features -> identity_features, bias=False)
        "wk": jax.random.normal(ks[3], (IDENTITY_FEATURES, IDENTITY_FEATURES), jnp.float32) * 0.1,
        # project_v_action: Linear(action_features -> action_features, bias=False)
        "wv": jax.random.normal(ks[4], (ACTION_FEATURES, ACTION_FEATURES), jnp.float32) * 0.1,
        # action_encoder: Linear(action_size -> action_features)
        "wa": jax.random.normal(ks[5], (ACTION_FEATURES, ACTION_SIZE), jnp.float32) * 0.1,
        "ba": jax.random.normal(ks[6], (ACTION_FEATURES,), jnp.float32) * 0.1,
        # identity_encoder: Linear(num_objects_total -> identity_features)
        "wi": jax.random.normal(ks[7], (IDENTITY_FEATURES, NUM_OBJECTS), jnp.float32) * 0.1,
        "bi": jax.random.normal(ks[8], (IDENTITY_FEATURES,), jnp.float32) * 0.1,
        # norm_actions: LayerNorm(action_features)
        "ln_g": jnp.ones((ACTION_FEATURES,), jnp.float32),
        "ln_b": jnp.zeros((ACTION_FEATURES,), jnp.float32),
    }

    # Fold + pack constants ONCE (outside the jitted per-call path).
    const_slab = jax.block_until_ready(pack_constants(params))

    action_slots, action_attention = action_binding_attention(slots, actions, const_slab)
    action_slots = jax.block_until_ready(action_slots)
    action_attention = jax.block_until_ready(action_attention)

    assert action_slots.shape == (BATCH, NUM_SLOTS, ACTION_FEATURES)
    assert action_attention.shape == (BATCH, NUM_OBJECTS, NUM_SLOTS)

    ref_slots, ref_attn = _reference(slots, actions, params)
    # Tolerances relaxed slightly for the approx (EUP) reciprocal in the softmax.
    assert jnp.allclose(action_slots, ref_slots, atol=1e-3, rtol=1e-3)
    assert jnp.allclose(action_attention, ref_attn, atol=1e-3, rtol=1e-3)

    print("KERNEL_OK")
</pallas_src>

<mosaic_0001>
module attributes {stable_mosaic.version = 11 : i64} {
  func.func @_action_binding_kernel(%arg0: memref<16x48xf32, #tpu.memory_space<vmem>>, %arg1: memref<64x32xf32, #tpu.memory_space<vmem>>, %arg2: memref<8x32xf32, #tpu.memory_space<vmem>>) attributes {dimension_semantics = [], scalar_prefetch = 0 : i64, scratch_operands = 0 : i64, tpu.core_type = #tpu.core_type<tc>} {
    %c0 = arith.constant 0 : index
    %c0_0 = arith.constant 0 : index
    %0 = vector.load %arg0[%c0, %c0_0] : memref<16x48xf32, #tpu.memory_space<vmem>>, vector<16x48xf32>
    %c0_1 = arith.constant 0 : index
    %c0_2 = arith.constant 0 : index
    %1 = vector.load %arg1[%c0_1, %c0_2] : memref<64x32xf32, #tpu.memory_space<vmem>>, vector<48x32xf32>
    %c48 = arith.constant 48 : index
    %c0_3 = arith.constant 0 : index
    %2 = vector.load %arg1[%c48, %c0_3] : memref<64x32xf32, #tpu.memory_space<vmem>>, vector<16x16xf32>
    %c48_4 = arith.constant 48 : index
    %c16 = arith.constant 16 : index
    %3 = vector.load %arg1[%c48_4, %c16] : memref<64x32xf32, #tpu.memory_space<vmem>>, vector<16x16xf32>
    %cst = arith.constant dense<0.000000e+00> : vector<16x32xf32>
    %4 = tpu.matmul %0, %1, %cst {dimension_numbers = #tpu.dot_dimension_numbers<[1], [0], [0], [1], [0, 0, 1, 1], [], []>} : vector<16x48xf32>, vector<48x32xf32>, vector<16x32xf32> -> vector<16x32xf32>
    %5 = vector.extract_strided_slice %4 {offsets = [0, 0], sizes = [16, 16], strides = [1, 1]} : vector<16x32xf32> to vector<16x16xf32>
    %cst_5 = arith.constant dense<0.000000e+00> : vector<16xf32>
    %6 = vector.multi_reduction <add>, %5, %cst_5 [1] : vector<16x16xf32> to vector<16xf32>
    %7 = vector.shape_cast %6 : vector<16xf32> to vector<16x1xf32>
    %cst_6 = arith.constant 1.600000e+01 : f32
    %8 = vector.broadcast %cst_6 : f32 to vector<16x1xf32>
    %9 = arith.divf %7, %8 : vector<16x1xf32>
    %10 = vector.broadcast %9 : vector<16x1xf32> to vector<16x16xf32>
    %11 = arith.subf %5, %10 : vector<16x16xf32>
    %12 = arith.mulf %11, %11 : vector<16x16xf32>
    %cst_7 = arith.constant dense<0.000000e+00> : vector<16xf32>
    %13 = vector.multi_reduction <add>, %12, %cst_7 [1] : vector<16x16xf32> to vector<16xf32>
    %14 = vector.shape_cast %13 : vector<16xf32> to vector<16x1xf32>
    %cst_8 = arith.constant 1.600000e+01 : f32
    %15 = vector.broadcast %cst_8 : f32 to vector<16x1xf32>
    %16 = arith.divf %14, %15 : vector<16x1xf32>
    %cst_9 = arith.constant 9.99999974E-6 : f32
    %17 = vector.broadcast %cst_9 : f32 to vector<16x1xf32>
    %18 = arith.addf %16, %17 : vector<16x1xf32>
    %19 = math.rsqrt %18 : vector<16x1xf32>
    %20 = vector.broadcast %19 : vector<16x1xf32> to vector<16x16xf32>
    %21 = arith.mulf %11, %20 : vector<16x16xf32>
    %cst_10 = arith.constant dense<0.000000e+00> : vector<16x16xf32>
    %22 = tpu.matmul %21, %2, %cst_10 {dimension_numbers = #tpu.dot_dimension_numbers<[1], [0], [0], [1], [0, 0, 1, 1], [], []>} : vector<16x16xf32>, vector<16x16xf32>, vector<16x16xf32> -> vector<16x16xf32>
    %23 = arith.addf %22, %3 : vector<16x16xf32>
    %24 = vector.extract_strided_slice %4 {offsets = [0, 16], sizes = [8, 16], strides = [1, 1]} : vector<16x32xf32> to vector<8x16xf32>
    %25 = tpu.iota {dimensions = array<i32: 0>} : vector<8x16xi32>
    %26 = tpu.iota {dimensions = array<i32: 1>} : vector<8x16xi32>
    %c0_i32 = arith.constant 0 : i32
    %27 = vector.broadcast %c0_i32 : i32 to vector<8x16xi32>
    %28 = arith.cmpi sge, %25, %27 : vector<8x16xi32>
    %c4_i32 = arith.constant 4 : i32
    %29 = vector.broadcast %c4_i32 : i32 to vector<8x16xi32>
    %30 = arith.cmpi slt, %25, %29 : vector<8x16xi32>
    %31 = arith.andi %28, %30 : vector<8x16xi1>
    %c0_i32_11 = arith.constant 0 : i32
    %32 = vector.broadcast %c0_i32_11 : i32 to vector<8x16xi32>
    %33 = arith.cmpi sge, %26, %32 : vector<8x16xi32>
    %34 = arith.andi %31, %33 : vector<8x16xi1>
    %c5_i32 = arith.constant 5 : i32
    %35 = vector.broadcast %c5_i32 : i32 to vector<8x16xi32>
    %36 = arith.cmpi slt, %26, %35 : vector<8x16xi32>
    %37 = arith.andi %34, %36 : vector<8x16xi1>
    %c4_i32_12 = arith.constant 4 : i32
    %38 = vector.broadcast %c4_i32_12 : i32 to vector<8x16xi32>
    %39 = arith.cmpi sge, %25, %38 : vector<8x16xi32>
    %c8_i32 = arith.constant 8 : i32
    %40 = vector.broadcast %c8_i32 : i32 to vector<8x16xi32>
    %41 = arith.cmpi slt, %25, %40 : vector<8x16xi32>
    %42 = arith.andi %39, %41 : vector<8x16xi1>
    %c5_i32_13 = arith.constant 5 : i32
    %43 = vector.broadcast %c5_i32_13 : i32 to vector<8x16xi32>
    %44 = arith.cmpi sge, %26, %43 : vector<8x16xi32>
    %45 = arith.andi %42, %44 : vector<8x16xi1>
    %c10_i32 = arith.constant 10 : i32
    %46 = vector.broadcast %c10_i32 : i32 to vector<8x16xi32>
    %47 = arith.cmpi slt, %26, %46 : vector<8x16xi32>
    %48 = arith.andi %45, %47 : vector<8x16xi1>
    %49 = arith.ori %37, %48 : vector<8x16xi1>
    %cst_14 = arith.constant -1.000000e+30 : f32
    %50 = vector.broadcast %cst_14 : f32 to vector<8x16xf32>
    %51 = arith.select %49, %24, %50 : vector<8x16xi1>, vector<8x16xf32>
    %cst_15 = arith.constant dense<0xFF800000> : vector<16xf32>
    %52 = vector.multi_reduction <maximumf>, %51, %cst_15 [0] : vector<8x16xf32> to vector<16xf32>
    %53 = vector.shape_cast %52 : vector<16xf32> to vector<1x16xf32>
    %54 = vector.broadcast %53 : vector<1x16xf32> to vector<8x16xf32>
    %55 = arith.subf %51, %54 : vector<8x16xf32>
    %56 = math.exp %55 : vector<8x16xf32>
    %cst_16 = arith.constant 0.000000e+00 : f32
    %57 = vector.broadcast %cst_16 : f32 to vector<8x16xf32>
    %58 = arith.select %49, %56, %57 : vector<8x16xi1>, vector<8x16xf32>
    %cst_17 = arith.constant dense<0.000000e+00> : vector<16xf32>
    %59 = vector.multi_reduction <add>, %58, %cst_17 [0] : vector<8x16xf32> to vector<16xf32>
    %60 = vector.shape_cast %59 : vector<16xf32> to vector<1x16xf32>
    %cst_18 = arith.constant 9.99999968E-21 : f32
    %61 = vector.broadcast %cst_18 : f32 to vector<1x16xf32>
    %62 = arith.maximumf %60, %61 : vector<1x16xf32>
    %63 = tpu.reciprocal %62 {approx = true} : vector<1x16xf32> -> vector<1x16xf32>
    %64 = vector.broadcast %63 : vector<1x16xf32> to vector<8x16xf32>
    %65 = arith.mulf %58, %64 : vector<8x16xf32>
    %cst_19 = arith.constant 9.99999993E-9 : f32
    %cst_20 = arith.constant 0.000000e+00 : f32
    %66 = vector.broadcast %cst_19 : f32 to vector<8x16xf32>
    %67 = vector.broadcast %cst_20 : f32 to vector<8x16xf32>
    %68 = arith.select %49, %66, %67 : vector<8x16xi1>, vector<8x16xf32>
    %69 = arith.addf %65, %68 : vector<8x16xf32>
    %cst_21 = arith.constant dense<0.000000e+00> : vector<8x16xf32>
    %70 = tpu.matmul %69, %23, %cst_21 {dimension_numbers = #tpu.dot_dimension_numbers<[1], [0], [0], [1], [0, 0, 1, 1], [], []>} : vector<8x16xf32>, vector<16x16xf32>, vector<8x16xf32> -> vector<8x16xf32>
    %71 = vector.extract_strided_slice %65 {offsets = [0, 0], sizes = [8, 5], strides = [1, 1]} : vector<8x16xf32> to vector<8x5xf32>
    %72 = vector.extract_strided_slice %65 {offsets = [0, 5], sizes = [8, 5], strides = [1, 1]} : vector<8x16xf32> to vector<8x5xf32>
    %73 = arith.addf %71, %72 : vector<8x5xf32>
    %cst_22 = arith.constant 0.000000e+00 : f32
    %74 = vector.broadcast %cst_22 : f32 to vector<8x11xf32>
    %75 = tpu.concatenate %70, %73, %74 in 1 : vector<8x16xf32>, vector<8x5xf32>, vector<8x11xf32> -> vector<8x32xf32>
    %c0_23 = arith.constant 0 : index
    %c0_24 = arith.constant 0 : index
    %76 = vector.load %arg2[%c0_23, %c0_24] : memref<8x32xf32, #tpu.memory_space<vmem>>, vector<8x32xf32>
    tpu.vector_store %arg2[%c0_23, %c0_24], %75 {strides = array<i32>} : memref<8x32xf32, #tpu.memory_space<vmem>>, vector<8x32xf32>,
    return
  }
}

</mosaic_0001>

<bundles_post_ra>
// kernel: action_binding_attention.1
= control target key start
LH: loop header
LB: loop body
LE: loop exit
PB: predicated region body
PF: predicated region fallthrough
CT: control target
= control target key end

     0   :  { %vm21_vm0 = vcmask 392192   ;;  %vm103_vm1 = vcmask 130048   ;;  %s440_s25 = smov 112   ;;  %v220_v15 = vlaneseq  ;;  %s442_s29 = smov 16   ;;  %vm444_vm11 = vmmov 0   ;;  %s519_s1 = inlined_call_operand.vmem [shape: f32[64,32], index: 1, kind: input, shape index: {}]   ;;  %s520_s0 = inlined_call_operand.vmem [shape: f32[16,48], index: 0, kind: input, shape index: {}]   ;;  %s521_s2 = inlined_call_operand.vmem [shape: f32[8,32], index: 2, kind: output, shape index: {}]  }
   0x1   :  { %v13_v0 = vld [vmem:[%s519_s1] sm:$0xff]  ;;  %v14_v1 = vld [vmem:[%s519_s1 + $0x8] sm:$0xff]  ;;  %v15_v2 = vld [vmem:[%s519_s1 + $0x10] sm:$0xff]  ;;  %vm350_vm12 = vcmask 171008   ;;  %vm352_vm13 = vcmask 261120  }
   0x2   :  { %v407_v3 = vpack.c.bf16 %v14_v1, %v13_v0  ;;  %v16_v4 = vld [vmem:[%s519_s1 + $0x18] sm:$0xff]  ;;  %v17_v6 = vld [vmem:[%s519_s1 + $0x20] sm:$0xff]  ;;  %v18_v7 = vld [vmem:[%s519_s1 + $0x28] sm:$0xff]  ;;  %v221_v16 = vshrl.u32 %v220_v15, 7  ;;  %v223_v17 = vand.u32 127, %v220_v15 }
   0x3   :  { %v411_v5 = vpack.c.bf16 %v16_v4, %v15_v2  ;;  %v11_v8 = vld [vmem:[%s520_s0] sm:$0xff]  ;;  %v415_v9 = vpack.c.bf16 %v18_v7, %v17_v6  ;;  %v12_v10 = vld [vmem:[%s520_s0 + $0x8] sm:$0xff]  ;;  %v19_v40 = vld [vmem:[%s519_s1 + $0x30] sm:$0xff]  ;;  %v445_v6 = vmov 0.0  }
   0x4   :  { %408 = vmatprep.subr.bf16.mxu0 %v407_v3  ;;  %390 = vmatprep.mubr.msk.f32.mxu0 %vm21_vm0, %v11_v8  ;;  %vm231_vm2 = vcmp.ge.s32.totalorder %v221_v16, 4  ;;  %vm234_vm3 = vcmp.ge.s32.totalorder %v223_v17, 5  ;;  %vm225_vm4 = vcmp.lt.s32.totalorder %v221_v16, 4  ;;  %vm229_vm5 = vcmp.lt.s32.totalorder %v223_v17, 5  ;;  %v20_v41 = vld [vmem:[%s519_s1 + $0x38] sm:$0xff]  ;;  %s441_s1 = smov 123  }
   0x5   :  { %410 = vmatpush3.bf16.msra.mxu0 %v407_v3  ;;  %vm235_vm6 = vmand %vm231_vm2, %vm234_vm3  ;;  %vm236_vm7 = vcmp.lt.s32.totalorder %v223_v17, 10  ;;  %v419_v42 = vpack.c.bf16 %v20_v41, %v19_v40 }
   0x6   :  { %412 = vmatprep.subr.bf16.mxu0 %v411_v5  ;;  %vm230_vm8 = vmand %vm225_vm4, %vm229_vm5 }
   0x7   :  { %vm237_vm9 = vmand %vm235_vm6, %vm236_vm7  ;;  %420 = vmatprep.subr.bf16.mxu1 %v419_v42 }
   0x8   :  { %vm490_vm10 = vmor %vm230_vm8, %vm237_vm9  ;;  %422 = vmatpush3.bf16.msra.mxu1 %v419_v42 }
   0x9   :  { %414 = vmatpush3.bf16.msra.mxu0 %v411_v5  ;;  %v443_v5 = vmov 0.0|0.0  }
   0xa   :  { %416 = vmatprep.subr.bf16.mxu0 %v415_v9  ;;  %423 = vmatprep.subr.bf16.mxu1 %v443_v5 }
   0xd   :  { %418 = vmatpush3.bf16.msra.mxu0 %v415_v9 }
  0x10   :  { %391 = vmatmul.mubr.msk.f32.vlgmr.msra.gmra.mrb[0].mxu0 %vm21_vm0, %v12_v10 }
  0xe3   :  { %v392_v11 = vpop.f32.mrb[0].mxu0 }
  0xe4   :  { %v94_v12 = vpop.f32.mrb[1].mxu0  ;;  %v107_v14 = vsel %vm103_vm1, %v392_v11, 0.0 }
  0xe5   :  { %v104_v13 = vsel %vm103_vm1, %v94_v12, 0.0 }
  0xe6   :  { %105 = vadd.xlane.f32.xlu0 %v104_v13 }
  0xea   :  { %108 = vadd.xlane.f32.xlu0 %v107_v14 }
 0x100   :  { %240 = vrot.lane.b32.xlu0 %v94_v12, %s440_s25 }
 0x173   :  { %v106_v18 = vpop.xlane.xlu0 %105 }
 0x174   :  { %v111_v19 = vmul.f32 0.0625, %v106_v18 }
 0x176   :  { %v113_v20 = vsub.f32 %v94_v12, %v111_v19  ;;  %v265_v12 = vsel %vm490_vm10, 1e-08, %v445_v6 }
 0x177   :  { %v109_v21 = vpop.xlane.xlu0 %108 }
 0x178   :  { %v112_v22 = vmul.f32 0.0625, %v109_v21  ;;  %v115_v23 = vmul.f32 %v113_v20, %v113_v20 }
 0x17a   :  { %v114_v25 = vsub.f32 %v392_v11, %v112_v22  ;;  %v117_v26 = vsel %vm103_vm1, %v115_v23, 0.0 }
 0x17b   :  { %118 = vadd.xlane.f32.xlu1 %v117_v26  ;;  %v241_v27 = vpop.permute.xlu0 %240 }
 0x17c   :  { %v243_v28 = vsel %vm490_vm10, %v241_v27, -1e+30  ;;  %v116_v29 = vmul.f32 %v114_v25, %v114_v25 }
 0x17d   :  { %v244_v30 = vsel %vm103_vm1, %v243_v28, -inf }
 0x17e   :  { %v245_v31 = vrot.slane %v244_v30, 4  ;;  %v120_v32 = vsel %vm103_vm1, %v116_v29, 0.0 }
 0x17f   :  { %121 = vadd.xlane.f32.xlu1 %v120_v32 }
 0x180   :  { %v246_v33 = vmax.f32 %v244_v30, %v245_v31 }
 0x182   :  { %v247_v34 = vrot.slane %v246_v33, 2 }
 0x184   :  { %v248_v35 = vmax.f32 %v246_v33, %v247_v34 }
 0x186   :  { %v249_v36 = vrot.slane %v248_v35, 1 }
 0x188   :  { %v250_v37 = vmax.f32 %v248_v35, %v249_v36 }
 0x18a   :  { %v251_v38 = vsub.f32 %v243_v28, %v250_v37 }
 0x18c   :  { %v252_v39 = vmul.f32 1.442695, %v251_v38 }
 0x18e   :  { %432 = vpow2.f32 %v252_v39 }
 0x190   :  { %133 = vrot.lane.b32.xlu1 %v19_v40, %s440_s25 }
 0x194   :  { %135 = vrot.lane.b32.xlu1 %v20_v41, %s440_s25 }
 0x198   :  { %v433_v43 = vpop.eup %432 }
 0x199   :  { %v254_v44 = vsel %vm490_vm10, %v433_v43, 0.0 }
 0x19a   :  { %v255_v45 = vsel %vm103_vm1, %v254_v44, 0.0 }
 0x19b   :  { %v256_v46 = vrot.slane %v255_v45, 4 }
 0x19d   :  { %v257_v47 = vadd.f32 %v256_v46, %v255_v45 }
 0x19f   :  { %v258_v48 = vrot.slane %v257_v47, 2 }
 0x1a1   :  { %v259_v49 = vadd.f32 %v258_v48, %v257_v47 }
 0x1a3   :  { %v260_v50 = vrot.slane %v259_v49, 1 }
 0x1a5   :  { %v261_v51 = vadd.f32 %v260_v50, %v259_v49 }
 0x1a7   :  { %v262_v52 = vmax.f32 %v261_v51, 1e-20 }
 0x1a9   :  { %434 = vrcp.f32 %v262_v52 }
 0x1b3   :  { %v435_v53 = vpop.eup %434 }
 0x1b4   :  { %v264_v54 = vmul.f32 %v435_v53, %v254_v44 }
 0x1b6   :  { %341 = vrot.lane.b32.xlu1 %v264_v54, %s441_s1  ;;  %v266_v13 = vadd.f32 %v265_v12, %v264_v54 }
 0x208   :  { %v119_v55 = vpop.xlane.xlu1 %118 }
 0x209   :  { %v123_v56 = vmul.f32 0.0625, %v119_v55 }
 0x20b   :  { %v125_v57 = vadd.f32 1e-05, %v123_v56 }
 0x20c   :  { %v122_v58 = vpop.xlane.xlu1 %121 }
 0x20d   :  { %436 = vrsqrt.f32 %v125_v57  ;;  %v124_v59 = vmul.f32 0.0625, %v122_v58 }
 0x20f   :  { %v126_v60 = vadd.f32 1e-05, %v124_v59 }
 0x210   :  { %v134_v1 = vpop.permute.xlu1 %133 }
 0x211   :  { %438 = vrsqrt.f32 %v126_v60 }
 0x214   :  { %v136_v2 = vpop.permute.xlu1 %135 }
 0x217   :  { %v437_v61 = vpop.eup %436 }
 0x218   :  { %v129_v62 = vmul.f32 %v437_v61, %v113_v20 }
 0x21a   :  { %397 = vmatprep.mubr.msk.f32.mxu1 %vm103_vm1, %v129_v62 }
 0x21b   :  { %v439_v63 = vpop.eup %438 }
 0x21c   :  { %v130_v0 = vmul.f32 %v439_v63, %v114_v25 }
 0x21e   :  { %398 = vmatmul.mubr.msk.f32.vlgmr.msra.gmra.mrb[0].mxu1 %vm103_vm1, %v130_v0 }
 0x21f   :  { %404 = vmatprep.mubr.msk.f32.mxu1 %vm444_vm11, %v445_v6 }
 0x228   :  { %v342_v3 = vpop.permute.xlu1 %341 }
 0x229   :  { %v344_v4 = vadd.f32 %v342_v3, %v264_v54 }
 0x22b   :  { %346 = vrot.lane.b32.xlu0 %v344_v4, %s442_s29 }
 0x29d   :  { %v347_v14 = vpop.permute.xlu0 %346 }
 0x2f1   :  { %v399_v7 = vpop.f32.mrb[0].mxu1 }
 0x2f2   :  { %v217_v8 = vadd.f32 %v399_v7, %v136_v2  ;;  %v211_v9 = vpop.f32.mrb[1].mxu1 }
 0x2f3   :  { %v212_v10 = vadd.f32 %v211_v9, %v134_v1 }
 0x2f5   :  { %v424_v11 = vpack.c.bf16 %v217_v8, %v212_v10 }
 0x2f7   :  { %425 = vmatpush3.bf16.msra.mxu1 %v424_v11 }
 0x2fa   :  { %405 = vmatmul.mubr.msk.f32.vlgmr.msra.gmra.mrb[2].mxu1 %vm103_vm1, %v266_v13 }
 0x3cd   :  { %v336_v15 = vpop.f32.mrb[2].mxu1 }
 0x3ce   :  { %v349_v16 = vsel %vm103_vm1, %v336_v15, %v347_v14  ;;  %v406_v17 = vpop.f32.mrb[3].mxu1 }
 0x3cf   :  { %v351_v18 = vsel %vm350_vm12, %v349_v16, 0.0 }
 0x3d0   :  { %353 = vst.msk [vmem:[%s521_s2] sm:$0xff] %vm352_vm13, %v351_v18 }

</bundles_post_ra>
